<compile_context>
chip_gen: v7x
topology: tpu7x:2x2x1
jax: 0.10.0
libtpu: 0.0.40
codegen_flags: <defaults>
</compile_context>

<pallas_src>
import jax
import jax.numpy as jnp
from jax.experimental import pallas as pl
from jax.experimental.pallas import tpu as pltpu


def _st4_kernel(x_ref, inp_ref, wg_ref, bg_ref, wb_ref, bb_ref, o_ref):
    # x_ref:   (tb, C, Sx)  features used for the pooled statistics
    # inp_ref: (tb, C, S)   tensor being modulated
    # wg_ref/wb_ref: (C, C) linear weights, already transposed to (in, out)
    # bg_ref/bb_ref: (1, C) biases
    # o_ref:   (tb, C, S)
    x = x_ref[...].astype(jnp.float32)
    sx = x.shape[-1]

    mean = jnp.mean(x, axis=-1)                        # (tb, C)
    dev = x - mean[..., None]
    var = jnp.sum(dev * dev, axis=-1) / (sx - 1)       # unbiased: matches torch.std
    std = jnp.sqrt(var)                                # (tb, C)

    zg = jnp.dot(std, wg_ref[...], preferred_element_type=jnp.float32) + bg_ref[...]
    gamma = 1.0 / (1.0 + jnp.exp(-zg))                 # sigmoid
    beta = jnp.dot(mean, wb_ref[...], preferred_element_type=jnp.float32) + bb_ref[...]

    inp = inp_ref[...].astype(jnp.float32)
    out = gamma[..., None] * inp + beta[..., None]
    o_ref[...] = out.astype(o_ref.dtype)


def semantic_transformation4(x, inp, w_gamma, b_gamma, w_beta, b_beta, *, tb=4):
    """Equivalent to Semantic_Transformation4.forward(x, input).

    x:        (BT, C, Hx, Wx)  pooled for mean/std statistics
    inp:      (BT, C, H, W)    modulated tensor (the returned shape)
    w_gamma:  (C, C)  nn.Linear weight (out, in) for get_gamma
    b_gamma:  (C,)    nn.Linear bias for get_gamma
    w_beta:   (C, C)  nn.Linear weight (out, in) for get_beta
    b_beta:   (C,)    nn.Linear bias for get_beta
    tb:       rows of BT processed per grid step (tune for large H*W / VMEM)
    """
    BT, C, Hx, Wx = x.shape
    BTi, Ci, H, W = inp.shape
    assert BT == BTi and C == Ci, (x.shape, inp.shape)
    Sx, S = Hx * Wx, H * W

    # Trailing-dim merges are layout-trivial; no HBM transpose passes.
    x2 = x.reshape(BT, C, Sx)
    inp2 = inp.reshape(BT, C, S)
    wgT = w_gamma.T                # (C_in, C_out): kernel computes row @ W^T
    wbT = w_beta.T
    bg2 = b_gamma.reshape(1, C)
    bb2 = b_beta.reshape(1, C)

    grid = (pl.cdiv(BT, tb),)      # no explicit padding; partial block masked on write

    out = pl.pallas_call(
        _st4_kernel,
        out_shape=jax.ShapeDtypeStruct((BT, C, S), inp.dtype),
        grid_spec=pltpu.PrefetchScalarGridSpec(
            num_scalar_prefetch=0,
            grid=grid,
            in_specs=[
                pl.BlockSpec((tb, C, Sx), lambda i: (i, 0, 0)),
                pl.BlockSpec((tb, C, S), lambda i: (i, 0, 0)),
                pl.BlockSpec((C, C), lambda i: (0, 0)),
                pl.BlockSpec((1, C), lambda i: (0, 0)),
                pl.BlockSpec((C, C), lambda i: (0, 0)),
                pl.BlockSpec((1, C), lambda i: (0, 0)),
            ],
            out_specs=pl.BlockSpec((tb, C, S), lambda i: (i, 0, 0)),
        ),
        compiler_params=pltpu.CompilerParams(
            dimension_semantics=("parallel",)),
    )(x2, inp2, wgT, bg2, wbT, bb2)

    return out.reshape(BT, C, H, W)


def _reference(x, inp, w_gamma, b_gamma, w_beta, b_beta):
    """Pure-JAX reference matching the PyTorch module."""
    BT, C, Hx, Wx = x.shape
    xf = x.reshape(BT, C, Hx * Wx)
    out_mean = jnp.mean(xf, axis=-1)                      # AdaptiveAvgPool2d(1)
    out_std = jnp.std(xf, axis=-1, ddof=1)                # torch.std (unbiased)
    gamma = jax.nn.sigmoid(out_std @ w_gamma.T + b_gamma)
    beta = out_mean @ w_beta.T + b_beta
    return gamma[:, :, None, None] * inp + beta[:, :, None, None]


if __name__ == "__main__":
    # Small-but-representative shapes.  BT = batch*time frames; x and input may
    # have different spatial sizes (stats come from x, modulation hits input).
    B, T, C = 2, 4, 32
    BT = B * T
    Hx, Wx = 8, 8
    H, W = 16, 16

    key = jax.random.PRNGKey(0)
    kx, ki, kwg, kbg, kwb, kbb = jax.random.split(key, 6)
    x = jax.random.normal(kx, (BT, C, Hx, Wx), dtype=jnp.float32)
    inp = jax.random.normal(ki, (BT, C, H, W), dtype=jnp.float32)
    w_gamma = jax.random.normal(kwg, (C, C), dtype=jnp.float32) * 0.05
    b_gamma = jax.random.normal(kbg, (C,), dtype=jnp.float32) * 0.05
    w_beta = jax.random.normal(kwb, (C, C), dtype=jnp.float32) * 0.05
    b_beta = jax.random.normal(kbb, (C,), dtype=jnp.float32) * 0.05

    out = semantic_transformation4(x, inp, w_gamma, b_gamma, w_beta, b_beta, tb=4)
    out = jax.block_until_ready(out)

    ref = jax.block_until_ready(
        _reference(x, inp, w_gamma, b_gamma, w_beta, b_beta))
    assert out.shape == ref.shape, (out.shape, ref.shape)
    assert jnp.allclose(out, ref, rtol=1e-4, atol=1e-4), float(
        jnp.max(jnp.abs(out - ref)))

    print("KERNEL_OK")
</pallas_src>

<mosaic_0001>
module attributes {stable_mosaic.version = 11 : i64} {
  func.func @_st4_kernel(%arg0: i32, %arg1: memref<4x32x64xf32, #tpu.memory_space<vmem>>, %arg2: memref<4x32x256xf32, #tpu.memory_space<vmem>>, %arg3: memref<32x32xf32, #tpu.memory_space<vmem>>, %arg4: memref<1x32xf32, #tpu.memory_space<vmem>>, %arg5: memref<32x32xf32, #tpu.memory_space<vmem>>, %arg6: memref<1x32xf32, #tpu.memory_space<vmem>>, %arg7: memref<4x32x256xf32, #tpu.memory_space<vmem>>) attributes {dimension_semantics = [#tpu.dimension_semantics<parallel>], iteration_bounds = array<i64: 2>, scalar_prefetch = 0 : i64, scratch_operands = 0 : i64, tpu.core_type = #tpu.core_type<tc>, window_params = [{transform_indices = @transform_0, window_bounds = array<i64: 4, 32, 64>}, {transform_indices = @transform_1, window_bounds = array<i64: 4, 32, 256>}, {pipeline_mode = #tpu.pipeline_mode<synchronous>, transform_indices = @transform_2, window_bounds = array<i64: 32, 32>}, {pipeline_mode = #tpu.pipeline_mode<synchronous>, transform_indices = @transform_3, window_bounds = array<i64: 1, 32>}, {pipeline_mode = #tpu.pipeline_mode<synchronous>, transform_indices = @transform_4, window_bounds = array<i64: 32, 32>}, {pipeline_mode = #tpu.pipeline_mode<synchronous>, transform_indices = @transform_5, window_bounds = array<i64: 1, 32>}, {transform_indices = @transform_6, window_bounds = array<i64: 4, 32, 256>}]} {
    %c0 = arith.constant 0 : index
    %c0_0 = arith.constant 0 : index
    %c0_1 = arith.constant 0 : index
    %0 = vector.load %arg1[%c0, %c0_0, %c0_1] : memref<4x32x64xf32, #tpu.memory_space<vmem>>, vector<4x32x64xf32>
    %cst = arith.constant dense<0.000000e+00> : vector<4x32xf32>
    %1 = vector.multi_reduction <add>, %0, %cst [2] : vector<4x32x64xf32> to vector<4x32xf32>
    %cst_2 = arith.constant 6.400000e+01 : f32
    %2 = vector.broadcast %cst_2 : f32 to vector<4x32xf32>
    %3 = arith.divf %1, %2 : vector<4x32xf32>
    %4 = vector.shape_cast %3 : vector<4x32xf32> to vector<4x32x1xf32>
    %5 = vector.broadcast %4 : vector<4x32x1xf32> to vector<4x32x64xf32>
    %6 = arith.subf %0, %5 : vector<4x32x64xf32>
    %7 = arith.mulf %6, %6 : vector<4x32x64xf32>
    %cst_3 = arith.constant dense<0.000000e+00> : vector<4x32xf32>
    %8 = vector.multi_reduction <add>, %7, %cst_3 [2] : vector<4x32x64xf32> to vector<4x32xf32>
    %cst_4 = arith.constant 6.300000e+01 : f32
    %9 = vector.broadcast %cst_4 : f32 to vector<4x32xf32>
    %10 = arith.divf %8, %9 : vector<4x32xf32>
    %11 = math.sqrt %10 : vector<4x32xf32>
    %c0_5 = arith.constant 0 : index
    %c0_6 = arith.constant 0 : index
    %12 = vector.load %arg3[%c0_5, %c0_6] : memref<32x32xf32, #tpu.memory_space<vmem>>, vector<32x32xf32>
    %cst_7 = arith.constant dense<0.000000e+00> : vector<4x32xf32>
    %13 = tpu.matmul %11, %12, %cst_7 {dimension_numbers = #tpu.dot_dimension_numbers<[1], [0], [0], [1], [0, 0, 1, 1], [], []>} : vector<4x32xf32>, vector<32x32xf32>, vector<4x32xf32> -> vector<4x32xf32>
    %c0_8 = arith.constant 0 : index
    %c0_9 = arith.constant 0 : index
    %14 = vector.load %arg4[%c0_8, %c0_9] : memref<1x32xf32, #tpu.memory_space<vmem>>, vector<1x32xf32>
    %15 = vector.broadcast %14 : vector<1x32xf32> to vector<4x32xf32>
    %16 = arith.addf %13, %15 : vector<4x32xf32>
    %cst_10 = arith.constant 0.000000e+00 : f32
    %17 = vector.broadcast %cst_10 : f32 to vector<4x32xf32>
    %18 = arith.subf %17, %16 : vector<4x32xf32>
    %19 = math.exp %18 : vector<4x32xf32>
    %cst_11 = arith.constant 1.000000e+00 : f32
    %20 = vector.broadcast %cst_11 : f32 to vector<4x32xf32>
    %21 = arith.addf %20, %19 : vector<4x32xf32>
    %cst_12 = arith.constant 1.000000e+00 : f32
    %22 = vector.broadcast %cst_12 : f32 to vector<4x32xf32>
    %23 = arith.divf %22, %21 : vector<4x32xf32>
    %c0_13 = arith.constant 0 : index
    %c0_14 = arith.constant 0 : index
    %24 = vector.load %arg5[%c0_13, %c0_14] : memref<32x32xf32, #tpu.memory_space<vmem>>, vector<32x32xf32>
    %cst_15 = arith.constant dense<0.000000e+00> : vector<4x32xf32>
    %25 = tpu.matmul %3, %24, %cst_15 {dimension_numbers = #tpu.dot_dimension_numbers<[1], [0], [0], [1], [0, 0, 1, 1], [], []>} : vector<4x32xf32>, vector<32x32xf32>, vector<4x32xf32> -> vector<4x32xf32>
    %c0_16 = arith.constant 0 : index
    %c0_17 = arith.constant 0 : index
    %26 = vector.load %arg6[%c0_16, %c0_17] : memref<1x32xf32, #tpu.memory_space<vmem>>, vector<1x32xf32>
    %27 = vector.broadcast %26 : vector<1x32xf32> to vector<4x32xf32>
    %28 = arith.addf %25, %27 : vector<4x32xf32>
    %c0_18 = arith.constant 0 : index
    %c0_19 = arith.constant 0 : index
    %c0_20 = arith.constant 0 : index
    %29 = vector.load %arg2[%c0_18, %c0_19, %c0_20] : memref<4x32x256xf32, #tpu.memory_space<vmem>>, vector<4x32x256xf32>
    %30 = vector.shape_cast %23 : vector<4x32xf32> to vector<4x32x1xf32>
    %31 = vector.broadcast %30 : vector<4x32x1xf32> to vector<4x32x256xf32>
    %32 = arith.mulf %31, %29 : vector<4x32x256xf32>
    %33 = vector.shape_cast %28 : vector<4x32xf32> to vector<4x32x1xf32>
    %34 = vector.broadcast %33 : vector<4x32x1xf32> to vector<4x32x256xf32>
    %35 = arith.addf %32, %34 : vector<4x32x256xf32>
    %c0_21 = arith.constant 0 : index
    %c0_22 = arith.constant 0 : index
    %c0_23 = arith.constant 0 : index
    %36 = vector.load %arg7[%c0_21, %c0_22, %c0_23] : memref<4x32x256xf32, #tpu.memory_space<vmem>>, vector<4x32x256xf32>
    tpu.vector_store %arg7[%c0_21, %c0_22, %c0_23], %35 {strides = array<i32>} : memref<4x32x256xf32, #tpu.memory_space<vmem>>, vector<4x32x256xf32>,
    return
  }
  func.func @transform_0(%arg0: i32) -> (i32, i32, i32) {
    %c0_i32 = arith.constant 0 : i32
    %c0_i32_0 = arith.constant 0 : i32
    %c0_i32_1 = arith.constant 0 : i32
    return %arg0, %c0_i32, %c0_i32_0 : i32, i32, i32
  }
  func.func @transform_1(%arg0: i32) -> (i32, i32, i32) {
    %c0_i32 = arith.constant 0 : i32
    %c0_i32_0 = arith.constant 0 : i32
    %c0_i32_1 = arith.constant 0 : i32
    return %arg0, %c0_i32, %c0_i32_0 : i32, i32, i32
  }
  func.func @transform_2(%arg0: i32) -> (i32, i32) {
    %c0_i32 = arith.constant 0 : i32
    %c0_i32_0 = arith.constant 0 : i32
    %c0_i32_1 = arith.constant 0 : i32
    return %c0_i32, %c0_i32_0 : i32, i32
  }
  func.func @transform_3(%arg0: i32) -> (i32, i32) {
    %c0_i32 = arith.constant 0 : i32
    %c0_i32_0 = arith.constant 0 : i32
    %c0_i32_1 = arith.constant 0 : i32
    return %c0_i32, %c0_i32_0 : i32, i32
  }
  func.func @transform_4(%arg0: i32) -> (i32, i32) {
    %c0_i32 = arith.constant 0 : i32
    %c0_i32_0 = arith.constant 0 : i32
    %c0_i32_1 = arith.constant 0 : i32
    return %c0_i32, %c0_i32_0 : i32, i32
  }
  func.func @transform_5(%arg0: i32) -> (i32, i32) {
    %c0_i32 = arith.constant 0 : i32
    %c0_i32_0 = arith.constant 0 : i32
    %c0_i32_1 = arith.constant 0 : i32
    return %c0_i32, %c0_i32_0 : i32, i32
  }
  func.func @transform_6(%arg0: i32) -> (i32, i32, i32) {
    %c0_i32 = arith.constant 0 : i32
    %c0_i32_0 = arith.constant 0 : i32
    %c0_i32_1 = arith.constant 0 : i32
    return %arg0, %c0_i32, %c0_i32_0 : i32, i32, i32
  }
}

</mosaic_0001>

<bundles_post_ra>
// kernel: tpu_custom_call.1
= control target key start
LH: loop header
LB: loop body
LE: loop exit
PB: predicated region body
PF: predicated region fallthrough
CT: control target
= control target key end

     0   :  { %s2695_s0 = inlined_call_operand.hbm [shape: f32[8,32,64], index: 0, kind: input, shape index: {}]   ;;  %s2696_s1 = inlined_call_operand.hbm [shape: f32[8,32,256], index: 1, kind: input, shape index: {}]   ;;  %s2697_s2 = inlined_call_operand.hbm [shape: f32[32,32], index: 2, kind: input, shape index: {}]   ;;  %s2698_s3 = inlined_call_operand.vmem [shape: f32[1,32], index: 3, kind: input, shape index: {}]   ;;  %s2699_s4 = inlined_call_operand.hbm [shape: f32[32,32], index: 4, kind: input, shape index: {}]   ;;  %s2700_s5 = inlined_call_operand.vmem [shape: f32[1,32], index: 5, kind: input, shape index: {}]   ;;  %s2701_s6 = inlined_call_operand.hbm [shape: f32[8,32,256], index: 6, kind: output, shape index: {}]  }
   0x1   :  { %2713 = sst [smem:[#allocation17_spill]] %s2695_s0 }
   0x2   :  { %2714 = sst [smem:[#allocation18_spill]] %s2697_s2 }
   0x3   :  { %2715 = sst [smem:[#allocation19_spill]] %s2699_s4 }
   0x4   :  { %11 = vsyncpa [#allocation3], 0 }
   0x5   :  { %13 = vsyncpa [#allocation3 + $0x1], 0 }
   0x6   :  { %14 = vsyncpa [#allocation6], 0 }
   0x7   :  { %16 = vsyncpa [#allocation6 + $0x1], 0 }
   0x8   :  { %17 = vsyncpa [#allocation9], 0 }
   0x9   :  { %18 = vsyncpa [#allocation4], 0 }
   0xa   :  { %20 = vsyncpa [#allocation4 + $0x1], 0  ;;  %s1860_s21 = smov 0   ;;  %s1862_s22 = smov 0  }
   0xb   :  { %s1864_s23 = smov 0   ;;  %s1866_s24 = smov 0  }
   0xc LB: > { %s1881_s25 = sadd.s32 4294967295, %s1809_s24   ;;  %s1419_s26 = sadd.s32 4294967294, %s1809_s24   ;;  %s1809_s24 = sphi %s1866_s24, %s2754_s24   ;;  %s1805_s23 = sphi %s1864_s23, %s2753_s23   ;;  %s1801_s22 = sphi %s1862_s22, %s2752_s22   ;;  %s1797_s21 = sphi %s1860_s21, %s2751_s21  }
   0xd   : > { %p46_p0 = scmp.ne.s32.totalorder %s1801_s22, %s1797_s21  ;;  %p2702_p1 = scmp.eq.s32.totalorder %s1881_s25, 0 }
   0xe   : > { %p186_p3 = scmp.eq.s32.totalorder %s1419_s26, 1  ;;  %p1420_p5 = scmp.ge.s32.totalorder %s1809_s24, 1 }
   0xf   : > { %p1890_p4 = por %p2702_p1, %p46_p0  ;;  %p193_p7 = scmp.lt.s32.totalorder %s1809_s24, 3 }
  0x10   : > { %p1895_p6 = por %p186_p3, %p46_p0  ;;  %s1811_s30 = smov [#allocation7]  }
  0x11   : > { %s2716_s27 = scalar_select %p1890_p4, 1, 0 }
  0x12   : > { %s2717_s28 = scalar_select %p1895_p6, 1, 0 }
  0x13   : > { %p1900_p8 = pnand %p1420_p5, %p193_p7  ;;  %s205_s7 = sshll.u32 %s1811_s30, 4  ;;  %s1904_s7 = int_to_ptr.vmem [resolvable:$true] %s205_s7 }
  0x14   : > { %s1812_s9 = smov [#allocation8]   ;;  %s2720_s2 = sld [smem:[#allocation18_spill]] }
  0x15   : > { %p1512_p9 = pneg %p1900_p8  ;;  %s221_s10 = sshll.u32 %s1812_s9, 4  ;;  %s1915_s10 = int_to_ptr.vmem [resolvable:$true] %s221_s10 }
  0x17   : > { %p1911_p11 = pnand %p1512_p9, %p2702_p1 }
  0x19   : > { %p1617_p13 = pneg %p1911_p11 }
  0x1a   : > { %s1615_s13 = scalar_lea.hbm %s2720_s2, 512 }
  0x1b   : > { %p1616_p12 = scmp.ne.s32.totalorder %s2720_s2, %s1615_s13  ;;  %p1622_p5 = scmp.lt.u32.totalorder %s1615_s13, %s2720_s2 }
  0x1d   : > { %p1618_p0 = pnand %p1617_p13, %p1616_p12 }
  0x1f   : > { %p1619_p3 = pneg %p1618_p0 }
  0x21   : > { %p1624_p7 = pnand %p1622_p5, %p1619_p3 }
  0x23   : > { %1627 = shalt.err (!%p1624_p7)
}
  0x24   : > { %s1628_s18 = scalar_lea.vmem %s1904_s7, 512  ;;  %p1636_p2 = scmp.lt.s32.totalorder %s1904_s7, %s1904_s7 }
  0x25   : > { %p1629_p9 = scmp.ne.s32.totalorder %s1904_s7, %s1628_s18  ;;  %p1637_p12 = scmp.lt.s32.totalorder %s1628_s18, %s1628_s18 }
  0x27   : > { %p1631_p10 = pnand %p1629_p9, %p1617_p13  ;;  %p1638_p0 = por %p1637_p12, %p1636_p2 }
  0x29   : > { %p1632_p1 = pneg %p1631_p10 }
  0x2b   : > { %p1639_p6 = pnand %p1638_p0, %p1632_p1 }
  0x2d   : > { %1642 = shalt.err (!%p1639_p6)
}
  0x2e   : > { %s2703_s19 = smov 128   ;;  %s2704_s20 = smov 8  }
  0x2f   : > { %1515 = dma.hbm_to_vmem [thread:$0]  (!%p1911_p11), %s2720_s2, 512, %s1904_s7, [#allocation6], %s2703_s19, %s2703_s19, %s2704_s20  }
  0x30   : > { %s2721_s4 = sld [smem:[#allocation19_spill]] }
  0x36   : > { %s1643_s12 = scalar_lea.hbm %s2721_s4, 512 }
  0x37   : > { %p1644_p1 = scmp.ne.s32.totalorder %s2721_s4, %s1643_s12  ;;  %p1650_p10 = scmp.lt.u32.totalorder %s1643_s12, %s2721_s4 }
  0x39   : > { %p1646_p2 = pnand %p1644_p1, %p1617_p13 }
  0x3b   : > { %p1647_p6 = pneg %p1646_p2 }
  0x3d   : > { %p1652_p3 = pnand %p1650_p10, %p1647_p6 }
  0x3f   : > { %1655 = shalt.err (!%p1652_p3)
}
  0x40   : > { %s1656_s7 = scalar_lea.vmem %s1915_s10, 512  ;;  %p1664_p12 = scmp.lt.s32.totalorder %s1915_s10, %s1915_s10 }
  0x41   : > { %p1657_p5 = scmp.ne.s32.totalorder %s1915_s10, %s1656_s7  ;;  %p1665_p0 = scmp.lt.s32.totalorder %s1656_s7, %s1656_s7 }
  0x43   : > { %p1659_p7 = pnand %p1657_p5, %p1617_p13  ;;  %p1666_p1 = por %p1665_p0, %p1664_p12 }
  0x45   : > { %p1660_p9 = pneg %p1659_p7 }
  0x47   : > { %p1667_p2 = pnand %p1666_p1, %p1660_p9 }
  0x49   : > { %1670 = shalt.err (!%p1667_p2)
}
  0x4a   : > { %1518 = dma.hbm_to_vmem [thread:$0]  (!%p1911_p11), %s2721_s4, 512, %s1915_s10, [#allocation9], %s2703_s19, %s2703_s19, %s2704_s20  }
  0x4b   : > { %s1976_s8 = sadd.s32 1, %s1809_s24   ;;  %s33_s26 = sadd.s32 1, %s1805_s23 }
  0x4c   : > { %s30_s30 = ssub.s32 %s1809_s24, %s1976_s8  ;;  %p40_p13 = scmp.ne.s32.totalorder %s1805_s23, %s1801_s22 }
  0x4d   : > { %p31_p6 = scmp.eq.s32.totalorder %s30_s30, 0  ;;  %p41_p10 = scmp.eq.s32.totalorder %s1809_s24, 0 }
  0x4e   : > { %p2722_p3 = scmp.eq.s32.totalorder %s1881_s25, 1  ;;  %p1532_p7 = scmp.lt.s32.totalorder %s1809_s24, 2 }
  0x4f   : > { %s1992_s11 = scalar_select %p31_p6, %s1805_s23, %s33_s26  }
  0x50   : > { %p1986_p5 = por %p2722_p3, %p40_p13  ;;  %p42_p9 = por %p41_p10, %p40_p13 }
  0x51   : > { %2724 = sst [smem:[#allocation16_spill]] %s1992_s11  ;;  %s1995_s12 = sand.u32 1, %s1805_s23  }
  0x52   : > { %s2723_s9 = scalar_select %p1986_p5, 1, 0 }
  0x53   : > { %s1424_s10 = sshll.u32 %s1995_s12, 7  ;;  %s1449_s13 = sshll.u32 %s1809_s24, 11 }
  0x54   : > { %s2725_s0 = sld [smem:[#allocation17_spill]]  ;;  %s242_s7 = scalar_lea.vmem [#allocation2], %s1424_s10 }
  0x55   : > { %s250_s17 = sshll.u32 %s242_s7, 4  ;;  %p2006_p11 = pnand %p1532_p7, %p42_p9  ;;  %s2004_s17 = int_to_ptr.vmem [resolvable:$true] %s250_s17 }
  0x56   : > { %s1428_s30 = sshll.u32 %s1995_s12, 8  ;;  %s239_s19 = scalar_lea.sflag [#allocation3], %s1995_s12 }
  0x57   : > { %p1673_p0 = pneg %p2006_p11 }
  0x5a   : > { %s2002_s16 = scalar_lea.hbm %s2725_s0, %s1449_s13  ;;  %s1676_s15 = scalar_lea.hbm %s2725_s0, 4096 }
  0x5b   : > { %s1671_s14 = scalar_lea.hbm %s2002_s16, 2048  ;;  %p1677_p13 = scmp.lt.u32.totalorder %s2002_s16, %s2725_s0 }
  0x5c   : > { %p1672_p12 = scmp.ne.s32.totalorder %s2002_s16, %s1671_s14  ;;  %p1678_p6 = scmp.lt.u32.totalorder %s1676_s15, %s1671_s14 }
  0x5d   : > { %p1680_p3 = scmp.lt.u32.totalorder %s1671_s14, %s2002_s16 }
  0x5e   : > { %p1674_p1 = pnand %p1673_p0, %p1672_p12  ;;  %p1679_p10 = por %p1678_p6, %p1677_p13 }
  0x60   : > { %p1675_p2 = pneg %p1674_p1  ;;  %p1681_p7 = por %p1680_p3, %p1679_p10 }
  0x62   : > { %p1682_p9 = pnand %p1681_p7, %p1675_p2 }
  0x64   : > { %1685 = shalt.err (!%p1682_p9)
}
  0x65   : > { %s1686_s26 = scalar_lea.vmem %s2004_s17, 2048  ;;  %s1815_s10 = smov [#allocation2]  }
  0x66   : > { %p1687_p12 = scmp.ne.s32.totalorder %s2004_s17, %s1686_s26  ;;  %s1691_s13 = sshll.u32 %s1815_s10, 4  ;;  %s1692_s13 = int_to_ptr.vmem [resolvable:$false] %s1691_s13 }
  0x67   : > { %s1693_s20 = scalar_lea.vmem %s1692_s13, 4096  ;;  %p1694_p4 = scmp.lt.s32.totalorder %s2004_s17, %s1692_s13 }
  0x68   : > { %p1689_p1 = pnand %p1687_p12, %p1673_p0  ;;  %p1695_p13 = scmp.lt.s32.totalorder %s1693_s20, %s1686_s26 }
  0x6a   : > { %p1690_p5 = pneg %p1689_p1  ;;  %p1696_p6 = por %p1695_p13, %p1694_p4 }
  0x6c   : > { %p1697_p10 = pnand %p1696_p6, %p1690_p5 }
  0x6e   : > { %1700 = shalt.err (!%p1697_p10)
}
  0x6f   : > { %s2727_s14 = smov 8   ;;  %s2728_s15 = smov 128  }
  0x70   : > { %1522 = dma.hbm_to_vmem [thread:$0]  (!%p2006_p11), %s2002_s16, 2048, %s2004_s17, %s239_s19, %s2728_s15, %s2728_s15, %s2727_s14  }
  0x71   : > { %s1451_s7 = sshll.u32 %s1809_s24, 12  ;;  %s264_s20 = scalar_lea.vmem [#allocation5], %s1428_s30 }
  0x72   : > { %s2047_s13 = scalar_lea.hbm %s2696_s1, %s1451_s7  ;;  %s272_s0 = sshll.u32 %s264_s20, 4  ;;  %s2051_s0 = int_to_ptr.vmem [resolvable:$true] %s272_s0 }
  0x73   : > { %s2729_s2 = sand.u32 1, %s1809_s24   ;;  %s1701_s11 = scalar_lea.hbm %s2047_s13, 4096 }
  0x74   : > { %s2055_s4 = scalar_lea.sflag [#allocation6], %s2729_s2  ;;  %p1702_p4 = scmp.ne.s32.totalorder %s2047_s13, %s1701_s11 }
  0x75   : > { %s1706_s12 = scalar_lea.hbm %s2696_s1, 8192  ;;  %p1707_p3 = scmp.lt.u32.totalorder %s2047_s13, %s2696_s1 }
  0x76   : > { %p1704_p5 = pnand %p1702_p4, %p1673_p0  ;;  %p1708_p7 = scmp.lt.u32.totalorder %s1706_s12, %s1701_s11 }
  0x77   : > { %p1710_p12 = scmp.lt.u32.totalorder %s1701_s11, %s2047_s13 }
  0x78   : > { %p1705_p2 = pneg %p1704_p5  ;;  %p1709_p9 = por %p1708_p7, %p1707_p3 }
  0x7a   : > { %p1711_p1 = por %p1710_p12, %p1709_p9 }
  0x7c   : > { %p1712_p13 = pnand %p1711_p1, %p1705_p2 }
  0x7e   : > { %1715 = shalt.err (!%p1712_p13)
}
  0x7f   : > { %s1716_s2 = scalar_lea.vmem %s2051_s0, 4096  ;;  %s1816_s30 = smov [#allocation5]  }
  0x80   : > { %p1717_p6 = scmp.ne.s32.totalorder %s2051_s0, %s1716_s2  ;;  %s1721_s15 = sshll.u32 %s1816_s30, 4  ;;  %s1722_s15 = int_to_ptr.vmem [resolvable:$false] %s1721_s15 }
  0x81   : > { %s1723_s7 = scalar_lea.vmem %s1722_s15, 8192  ;;  %p1724_p5 = scmp.lt.s32.totalorder %s2051_s0, %s1722_s15 }
  0x82   : > { %p1719_p10 = pnand %p1717_p6, %p1673_p0  ;;  %p1725_p3 = scmp.lt.s32.totalorder %s1723_s7, %s1716_s2 }
  0x84   : > { %p1720_p4 = pneg %p1719_p10  ;;  %p1726_p7 = por %p1725_p3, %p1724_p5 }
  0x86   : > { %p1727_p9 = pnand %p1726_p7, %p1720_p4 }
  0x88   : > { %1730 = shalt.err (!%p1727_p9)
}
  0x89   : > { %s1817_s11 = smov 256   ;;  %s1818_s10 = smov 16  }
  0x8a   : > { %1525 = dma.hbm_to_vmem [thread:$0]  (!%p2006_p11), %s2047_s13, 4096, %s2051_s0, %s2055_s4, %s1817_s11, %s1817_s11, %s1818_s10  }
  0x8b   : > { %284 = sbr.rel (%p1900_p8) target bundleno = 915 (0x393), region = 44  ;;  %s2084_s26 = sand.u32 (!%p1900_p8), 1, %s1801_s22  }
  0x8c   : > { %s1433_s20 = sshll.u32 (!%p1900_p8), %s2084_s26, 7  ;;  %s287_s19 = scalar_lea.sflag (!%p1900_p8), [#allocation3], %s2084_s26 }
  0x8d   : > { %s2088_s16 = scalar_lea.vmem (!%p1900_p8), [#allocation2], %s1433_s20  ;;  %p2730_p0 = scmp.ne.s32.totalorder (!%p1900_p8), %s2716_s27, 0 }
  0x92   : > { %1776 = dma.done.wait (%p2730_p0), %s287_s19, 2048  }
  0x93   : > { %1778 = vsyncadd (%p2730_p0), %s287_s19, 4294965248  ;;  %s295_s0 = sand.u32 1, %s1881_s25   ;;  %s1434_s4 = sshll.u32 %s2084_s26, 8 }
  0x94   : > { %s296_s29 = scalar_lea.sflag [#allocation6], %s295_s0  ;;  %s2098_s18 = scalar_lea.vmem [#allocation5], %s1434_s4 }
  0x95   : > { %1780 = dma.done.wait (%p2730_p0), %s296_s29, 4096  }
  0x96   : > { %1782 = vsyncadd (%p2730_p0), %s296_s29, 4294963200  ;;  %p2731_p8 = scmp.eq.s32.totalorder %s1881_s25, 0 }
  0x98   : > { %1784 = dma.done.wait (%p2731_p8), [#allocation6], 512   ;;  %p2732_p11 = pmov %p2731_p8 }
  0x99   : > { %p2733_p2 = pmov %p2731_p8 }
  0x9a   : > { %1786 = vsyncadd (%p2732_p11), [#allocation6], 4294966784 }
  0x9b   : > { %1788 = dma.done.wait (%p2733_p2), [#allocation9], 512   ;;  %p2734_p12 = pmov %p2733_p2 }
  0x9c   : > { %vm360_vm0 = vcmask 523264   ;;  %v2113_v0 = vld [vmem:[%s2088_s16 + $0x20] sm:$0xff]  ;;  %v2119_v2 = vld [vmem:[%s2088_s16 + $0x28] sm:$0xff]  ;;  %v2133_v8 = vld [vmem:[%s2088_s16 + $0x30] sm:$0xff]  ;;  %v1819_v35 = vmov 0.0|0.0   ;;  %vm1820_vm1 = vmmov 0   ;;  %v662_v44 = vlaneseq }
  0x9d   : > { %1790 = vsyncadd (%p2734_p12), [#allocation9], 4294966784  ;;  %v2116_v1 = vld [vmem:[%s2088_s16] sm:$0xff]  ;;  %v373_v3 = vsel %vm360_vm0, %v2113_v0, 0.0  ;;  %v2126_v5 = vld [vmem:[%s2088_s16 + $0x8] sm:$0xff]  ;;  %v376_v6 = vsel %vm360_vm0, %v2119_v2, 0.0  ;;  %1492 = vmatprep.subr.bf16.mxu1 %v1819_v35  ;;  %1486 = vmatprep.subr.bf16.mxu0 %v1819_v35 }
  0x9e   : > { %v361_v4 = vsel %vm360_vm0, %v2116_v1, 0.0  ;;  %374 = vadd.xlane.f32.xlu1 %v373_v3  ;;  %v364_v7 = vsel %vm360_vm0, %v2126_v5, 0.0  ;;  %v2136_v9 = vld [vmem:[%s2088_s16 + $0x10] sm:$0xff]  ;;  %v379_v10 = vsel %vm360_vm0, %v2133_v8, 0.0  ;;  %v2143_v12 = vld [vmem:[%s2088_s16 + $0x48] sm:$0xff]  ;;  %v2146_v13 = vld [vmem:[%s2088_s16 + $0x40] sm:$0xff] }
  0x9f   : > { %362 = vadd.xlane.f32.xlu0 %v361_v4  ;;  %v367_v11 = vsel %vm360_vm0, %v2136_v9, 0.0  ;;  %v388_v14 = vsel %vm360_vm0, %v2143_v12, 0.0  ;;  %v385_v15 = vsel %vm360_vm0, %v2146_v13, 0.0  ;;  %v2153_v16 = vld [vmem:[%s2088_s16 + $0x38] sm:$0xff]  ;;  %v2163_v20 = vld [vmem:[%s2088_s16 + $0x60] sm:$0xff]  ;;  %v2166_v21 = vld [vmem:[%s2088_s16 + $0x50] sm:$0xff] }
  0xa0   : > { %v2156_v17 = vld [vmem:[%s2088_s16 + $0x18] sm:$0xff]  ;;  %v382_v18 = vsel %vm360_vm0, %v2153_v16, 0.0  ;;  %v397_v22 = vsel %vm360_vm0, %v2163_v20, 0.0  ;;  %v391_v23 = vsel %vm360_vm0, %v2166_v21, 0.0  ;;  %v2176_v25 = vld [vmem:[%s2088_s16 + $0x68] sm:$0xff]  ;;  %v2183_v28 = vld [vmem:[%s2088_s16 + $0x70] sm:$0xff] }
  0xa1   : > { %v370_v19 = vsel %vm360_vm0, %v2156_v17, 0.0  ;;  %v2173_v24 = vld [vmem:[%s2088_s16 + $0x58] sm:$0xff]  ;;  %v400_v27 = vsel %vm360_vm0, %v2176_v25, 0.0  ;;  %v403_v30 = vsel %vm360_vm0, %v2183_v28, 0.0  ;;  %v831_v32 = vld [vmem:[#allocation8] sm:$0xff]  ;;  %v832_v33 = vld [vmem:[#allocation8 + $0x8] sm:$0xff] }
  0xa2   : > { %377 = vadd.xlane.f32.xlu1 %v376_v6  ;;  %v394_v26 = vsel %vm360_vm0, %v2173_v24, 0.0  ;;  %v2186_v29 = vld [vmem:[%s2088_s16 + $0x78] sm:$0xff]  ;;  %v1493_v34 = vpack.c.bf16 %v832_v33, %v831_v32  ;;  %v833_v36 = vld [vmem:[#allocation8 + $0x10] sm:$0xff]  ;;  %v1821_v39 = vmov 0.0   ;;  %v663_v53 = vand.u32 127, %v662_v44  ;;  %s2568_s14 = scalar_lea.vmem [#allocation10], %s1434_s4 }
  0xa3   : > { %365 = vadd.xlane.f32.xlu0 %v364_v7  ;;  %v406_v31 = vsel %vm360_vm0, %v2186_v29, 0.0  ;;  %v834_v37 = vld [vmem:[#allocation8 + $0x18] sm:$0xff]  ;;  %1483 = vmatprep.mubr.msk.f32.mxu1 %vm1820_vm1, %v1821_v39  ;;  %v2213_v62 = vshrl.u32 %v662_v44, 7  ;;  %vm673_vm2 = vcmask 130112   ;;  %vm2712_vm3 = vcmask 195712   ;;  %s1453_s2 = sshll.u32 %s1881_s25, 12 }
  0xa4   : > { %1494 = vmatpush3.bf16.msra.mxu1 %v1493_v34  ;;  %v1496_v38 = vpack.c.bf16 %v834_v37, %v833_v36  ;;  %1472 = vmatprep.mubr.msk.f32.mxu0 %vm1820_vm1, %v1821_v39  ;;  %v668_v59 = vadd.s32 4294967288, %v663_v53  ;;  %v675_v4 = vadd.s32 4294967280, %v663_v53  ;;  %vm2711_vm4 = vcmask 261312   ;;  %s1304_s30 = sshll.u32 %s2568_s14, 4  ;;  %s2647_s11 = scalar_lea.hbm %s2701_s6, %s1453_s2  ;;  %s2649_s30 = int_to_ptr.vmem [resolvable:$true] %s1304_s30 }
  0xa5   : > { %1495 = vmatprep.subr.bf16.mxu1 %v1819_v35  ;;  %vm2710_vm5 = vcmask 1041409   ;;  %vm2709_vm6 = vcmask 1042434   ;;  %vm2708_vm7 = vcmask 1043459   ;;  %vm2707_vm8 = vcmask 261120   ;;  %s1290_s10 = scalar_lea.sflag [#allocation4], %s2084_s26  ;;  %s1731_s25 = scalar_lea.vmem %s2649_s30, 4096 }
  0xa6   : > { %380 = vadd.xlane.f32.xlu1 %v379_v10  ;;  %v2222_v10 = vsub.s32 %v668_v59, %v2213_v62  ;;  %p1732_p1 = scmp.ne.s32.totalorder %s2649_s30, %s1731_s25  ;;  %p2747_p13 = scmp.ne.s32.totalorder %s2723_s9, 0 }
  0xa7   : > { %368 = vadd.xlane.f32.xlu0 %v367_v11  ;;  %s1822_s20 = smov [#allocation10]  }
  0xa8   : > { %1497 = vmatpush3.bf16.msra.mxu1 %v1496_v38  ;;  %p1733_p6 = pnand %p1732_p1, %p2747_p13  ;;  %s1735_s19 = sshll.u32 %s1822_s20, 4  ;;  %s1736_s19 = int_to_ptr.vmem [resolvable:$false] %s1735_s19 }
  0xa9   : > { %s1737_s16 = scalar_lea.vmem %s1736_s19, 8192  ;;  %p1738_p4 = scmp.lt.s32.totalorder %s2649_s30, %s1736_s19 }
  0xaa   : > { %389 = vadd.xlane.f32.xlu1 %v388_v14  ;;  %p1734_p10 = pneg %p1733_p6  ;;  %p1739_p5 = scmp.lt.s32.totalorder %s1737_s16, %s1731_s25 }
  0xab   : > { %386 = vadd.xlane.f32.xlu0 %v385_v15  ;;  %v2229_v15 = vsub.s32 %v663_v53, %v2213_v62 }
  0xac   : > { %p1740_p3 = por %p1739_p5, %p1738_p4 }
  0xae   : > { %383 = vadd.xlane.f32.xlu1 %v382_v18  ;;  %p1741_p7 = pnand %p1740_p3, %p1734_p10 }
  0xaf   : > { %371 = vadd.xlane.f32.xlu0 %v370_v19 }
  0xb2   : > { %398 = vadd.xlane.f32.xlu1 %v397_v22 }
  0xb3   : > { %392 = vadd.xlane.f32.xlu0 %v391_v23 }
  0xb6   : > { %395 = vadd.xlane.f32.xlu1 %v394_v26  ;;  %v2239_v26 = vsub.s32 %v675_v4, %v2213_v62 }
  0xb7   : > { %401 = vadd.xlane.f32.xlu0 %v400_v27  ;;  %v682_v27 = vadd.s32 4294967272, %v663_v53 }
  0xba   : > { %407 = vadd.xlane.f32.xlu1 %v406_v31 }
  0xbb   : > { %404 = vadd.xlane.f32.xlu0 %v403_v30 }
 0x12b   : > { %v375_v40 = vpop.xlane.xlu1 %374 }
 0x12c   : > { %v363_v41 = vpop.xlane.xlu0 %362  ;;  %v2195_v42 = vmul.f32 0.015625, %v375_v40 }
 0x12d   : > { %v2197_v43 = vmul.f32 0.015625, %v363_v41 }
 0x12e   : > { %v430_v45 = vsub.f32 %v2113_v0, %v2195_v42  ;;  %v880_v23 = vrot.slane %v2195_v42, %v2229_v15  ;;  %v2251_v42 = vsub.s32 %v682_v27, %v2213_v62 }
 0x12f   : > { %v426_v46 = vsub.f32 %v2116_v1, %v2197_v43  ;;  %v378_v47 = vpop.xlane.xlu1 %377  ;;  %v861_v40 = vrot.slane %v2197_v43, %v2229_v15 }
 0x130   : > { %v366_v48 = vpop.xlane.xlu0 %365  ;;  %v415_v49 = vmul.f32 0.015625, %v378_v47  ;;  %v446_v52 = vmul.f32 %v430_v45, %v430_v45 }
 0x131   : > { %v2203_v50 = vmul.f32 0.015625, %v366_v48  ;;  %v442_v51 = vmul.f32 %v426_v46, %v426_v46 }
 0x132   : > { %v431_v54 = vsub.f32 %v2119_v2, %v415_v49  ;;  %v470_v63 = vsel %vm360_vm0, %v446_v52, 0.0  ;;  %v884_v33 = vrot.slane %v415_v49, %v2222_v10 }
 0x133   : > { %v427_v55 = vsub.f32 %v2126_v5, %v2203_v50  ;;  %v381_v56 = vpop.xlane.xlu1 %380  ;;  %v458_v57 = vsel %vm360_vm0, %v442_v51, 0.0  ;;  %v865_v41 = vrot.slane %v2203_v50, %v2222_v10 }
 0x134   : > { %v369_v58 = vpop.xlane.xlu0 %368  ;;  %v2209_v60 = vmul.f32 0.015625, %v381_v56  ;;  %459 = vadd.xlane.f32.xlu0 %v458_v57  ;;  %v447_v1 = vmul.f32 %v431_v54, %v431_v54  ;;  %v885_v47 = vsel %vm673_vm2, %v884_v33, %v880_v23 }
 0x135   : > { %v2211_v61 = vmul.f32 0.015625, %v369_v58  ;;  %v443_v0 = vmul.f32 %v427_v55, %v427_v55  ;;  %v866_v56 = vsel %vm673_vm2, %v865_v41, %v861_v40 }
 0x136   : > { %v432_v2 = vsub.f32 %v2133_v8, %v2209_v60  ;;  %v473_v8 = vsel %vm360_vm0, %v447_v1, 0.0 }
 0x137   : > { %v428_v3 = vsub.f32 %v2136_v9, %v2211_v61  ;;  %v390_v5 = vpop.xlane.xlu1 %389  ;;  %v461_v6 = vsel %vm360_vm0, %v443_v0, 0.0  ;;  %v870_v43 = vrot.slane %v2211_v61, %v2239_v26 }
 0x138   : > { %v387_v7 = vpop.xlane.xlu0 %386  ;;  %v2224_v11 = vmul.f32 0.015625, %v390_v5  ;;  %471 = vadd.xlane.f32.xlu0 %v470_v63  ;;  %462 = vadd.xlane.f32.xlu1 %v461_v6  ;;  %v448_v18 = vmul.f32 %v432_v2, %v432_v2 }
 0x139   : > { %v2226_v14 = vmul.f32 0.015625, %v387_v7  ;;  %v444_v9 = vmul.f32 %v428_v3, %v428_v3  ;;  %v871_v2 = vsel %vm2712_vm3, %v870_v43, %v866_v56  ;;  %v637_v43 = vld [vmem:[#allocation7 + $0x10] sm:$0xff] }
 0x13a   : > { %v435_v19 = vsub.f32 %v2143_v12, %v2224_v11  ;;  %v903_v52 = vrot.slane %v2224_v11, %v2222_v10 }
 0x13b   : > { %v434_v22 = vsub.f32 %v2146_v13, %v2226_v14  ;;  %v384_v30 = vpop.xlane.xlu1 %383  ;;  %v464_v31 = vsel %vm360_vm0, %v444_v9, 0.0  ;;  %v476_v13 = vsel %vm360_vm0, %v448_v18, 0.0  ;;  %v899_v53 = vrot.slane %v2226_v14, %v2229_v15 }
 0x13c   : > { %v372_v32 = vpop.xlane.xlu0 %371  ;;  %v417_v34 = vmul.f32 0.015625, %v384_v30  ;;  %474 = vadd.xlane.f32.xlu1 %v473_v8  ;;  %465 = vadd.xlane.f32.xlu0 %v464_v31  ;;  %v451_v37 = vmul.f32 %v435_v19, %v435_v19 }
 0x13d   : > { %v413_v12 = vmul.f32 0.015625, %v372_v32  ;;  %v450_v36 = vmul.f32 %v434_v22, %v434_v22  ;;  %v904_v5 = vsel %vm673_vm2, %v903_v52, %v899_v53 }
 0x13e   : > { %v433_v38 = vsub.f32 %v2153_v16, %v417_v34  ;;  %v889_v16 = vrot.slane %v2209_v60, %v2239_v26  ;;  %v485_v49 = vsel %vm360_vm0, %v451_v37, 0.0  ;;  %v894_v57 = vrot.slane %v417_v34, %v2251_v42 }
 0x13f   : > { %v429_v39 = vsub.f32 %v2156_v17, %v413_v12  ;;  %v399_v44 = vpop.xlane.xlu1 %398  ;;  %v482_v45 = vsel %vm360_vm0, %v450_v36, 0.0  ;;  %v875_v58 = vrot.slane %v413_v12, %v2251_v42 }
 0x140   : > { %v393_v46 = vpop.xlane.xlu0 %392  ;;  %v422_v48 = vmul.f32 0.015625, %v399_v44  ;;  %477 = vadd.xlane.f32.xlu1 %v476_v13  ;;  %483 = vadd.xlane.f32.xlu0 %v482_v45  ;;  %v449_v51 = vmul.f32 %v433_v38, %v433_v38 }
 0x141   : > { %v420_v17 = vmul.f32 0.015625, %v393_v46  ;;  %v445_v50 = vmul.f32 %v429_v39, %v429_v39  ;;  %v876_v23 = vsel %vm2711_vm4, %v875_v58, %v871_v2 }
 0x142   : > { %v438_v54 = vsub.f32 %v2163_v20, %v422_v48  ;;  %v479_v3 = vsel %vm360_vm0, %v449_v51, 0.0  ;;  %v918_v8 = vrot.slane %v422_v48, %v2229_v15  ;;  %v635_v48 = vld [vmem:[#allocation7] sm:$0xff] }
 0x143   : > { %v436_v55 = vsub.f32 %v2166_v21, %v420_v17  ;;  %v396_v59 = vpop.xlane.xlu1 %395  ;;  %v467_v60 = vsel %vm360_vm0, %v445_v50, 0.0  ;;  %v908_v63 = vrot.slane %v420_v17, %v2239_v26  ;;  %v890_v21 = vsel %vm2712_vm3, %v889_v16, %v885_v47  ;;  %v636_v17 = vld [vmem:[#allocation7 + $0x8] sm:$0xff]  ;;  %v638_v50 = vld [vmem:[#allocation7 + $0x18] sm:$0xff] }
 0x144   : > { %v402_v61 = vpop.xlane.xlu0 %401  ;;  %v421_v0 = vmul.f32 0.015625, %v396_v59  ;;  %486 = vadd.xlane.f32.xlu1 %v485_v49  ;;  %468 = vadd.xlane.f32.xlu0 %v467_v60  ;;  %v454_v4 = vmul.f32 %v438_v54, %v438_v54  ;;  %v895_v14 = vsel %vm2711_vm4, %v894_v57, %v890_v21  ;;  %v1487_v49 = vpack.c.bf16 %v636_v17, %v635_v48 }
 0x145   : > { %v423_v1 = vmul.f32 0.015625, %v402_v61  ;;  %v452_v20 = vmul.f32 %v436_v55, %v436_v55  ;;  %v909_v27 = vsel %vm2712_vm3, %v908_v63, %v904_v5  ;;  %v934_v40 = vsel %vm2710_vm5, %v895_v14, %v876_v23 }
 0x146   : > { %v437_v6 = vsub.f32 %v2173_v24, %v421_v0  ;;  %v913_v7 = vrot.slane %v421_v0, %v2251_v42  ;;  %v494_v31 = vsel %vm360_vm0, %v454_v4, 0.0  ;;  %1488 = vmatpush3.bf16.msra.mxu0 %v1487_v49  ;;  %v1490_v51 = vpack.c.bf16 %v638_v50, %v637_v43 }
 0x147   : > { %v439_v11 = vsub.f32 %v2176_v25, %v423_v1  ;;  %v922_v9 = vrot.slane %v423_v1, %v2222_v10  ;;  %v488_v18 = vsel %vm360_vm0, %v452_v20, 0.0  ;;  %v408_v22 = vpop.xlane.xlu1 %407  ;;  %1489 = vmatprep.subr.bf16.mxu0 %v1819_v35 }
 0x148   : > { %v405_v19 = vpop.xlane.xlu0 %404  ;;  %480 = vadd.xlane.f32.xlu1 %v479_v3  ;;  %489 = vadd.xlane.f32.xlu0 %v488_v18  ;;  %v425_v30 = vmul.f32 0.015625, %v408_v22  ;;  %v914_v25 = vsel %vm2711_vm4, %v913_v7, %v909_v27  ;;  %v453_v33 = vmul.f32 %v437_v6, %v437_v6 }
 0x149   : > { %v424_v24 = vmul.f32 0.015625, %v405_v19  ;;  %v455_v32 = vmul.f32 %v439_v11, %v439_v11  ;;  %v923_v37 = vsel %vm673_vm2, %v922_v9, %v918_v8 }
 0x14a   : > { %v441_v36 = vsub.f32 %v2186_v29, %v425_v30  ;;  %v932_v13 = vrot.slane %v425_v30, %v2251_v42  ;;  %v935_v29 = vsel %vm2709_vm6, %v914_v25, %v934_v40  ;;  %1491 = vmatpush3.bf16.msra.mxu0 %v1490_v51 }
 0x14b   : > { %v440_v34 = vsub.f32 %v2183_v28, %v424_v24  ;;  %v927_v12 = vrot.slane %v424_v24, %v2239_v26  ;;  %v497_v38 = vsel %vm360_vm0, %v455_v32, 0.0  ;;  %v491_v28 = vsel %vm360_vm0, %v453_v33, 0.0 }
 0x14c   : > { %495 = vadd.xlane.f32.xlu1 %v494_v31  ;;  %498 = vadd.xlane.f32.xlu0 %v497_v38  ;;  %v457_v45 = vmul.f32 %v441_v36, %v441_v36 }
 0x14d   : > { %v928_v39 = vsel %vm2712_vm3, %v927_v12, %v923_v37  ;;  %v456_v41 = vmul.f32 %v440_v34, %v440_v34 }
 0x14e   : > { %v933_v44 = vsel %vm2711_vm4, %v932_v13, %v928_v39  ;;  %v503_v16 = vsel %vm360_vm0, %v457_v45, 0.0 }
 0x14f   : > { %v936_v46 = vsel %vm2708_vm7, %v933_v44, %v935_v29  ;;  %v500_v47 = vsel %vm360_vm0, %v456_v41, 0.0 }
 0x150   : > { %1484 = vmatmul.mubr.msk.f32.vlgmr.msra.gmra.mrb[0].mxu1 %vm2707_vm8, %v936_v46  ;;  %492 = vadd.xlane.f32.xlu1 %v491_v28 }
 0x151   : > { %501 = vadd.xlane.f32.xlu0 %v500_v47 }
 0x154   : > { %504 = vadd.xlane.f32.xlu1 %v503_v16 }
 0x1c1   : > { %v460_v52 = vpop.xlane.xlu0 %459 }
 0x1c2   : > { %v507_v53 = vmul.f32 0.015873017, %v460_v52 }
 0x1c4   : > { %1579 = vrsqrt.f32 %v507_v53  ;;  %vm525_vm9 = vcmp.eq.f32.partialorder %v507_v53, inf  ;;  %vm527_vm10 = vcmp.eq.f32.partialorder %v507_v53, 0.0  ;;  %v528_v7 = vand.u32 2147483648, %v507_v53 }
 0x1c5   : > { %v463_v54 = vpop.xlane.xlu1 %462  ;;  %v472_v55 = vpop.xlane.xlu0 %471 }
 0x1c6   : > { %v2302_v56 = vmul.f32 0.015873017, %v463_v54  ;;  %v2304_v57 = vmul.f32 0.015873017, %v472_v55 }
 0x1c8   : > { %1581 = vrsqrt.f32 %v2302_v56  ;;  %vm532_vm11 = vcmp.eq.f32.partialorder %v2302_v56, inf  ;;  %v535_v8 = vand.u32 2147483648, %v2302_v56  ;;  %vm553_vm12 = vcmp.eq.f32.partialorder %v2304_v57, inf }
 0x1c9   : > { %v475_v58 = vpop.xlane.xlu1 %474  ;;  %v466_v59 = vpop.xlane.xlu0 %465  ;;  %1583 = vrsqrt.f32 %v2304_v57  ;;  %vm534_vm13 = vcmp.eq.f32.partialorder %v2302_v56, 0.0  ;;  %vm555_vm14 = vcmp.eq.f32.partialorder %v2304_v57, 0.0  ;;  %v556_v9 = vand.u32 2147483648, %v2304_v57 }
 0x1ca   : > { %v2308_v60 = vmul.f32 0.015873017, %v475_v58  ;;  %v2310_v61 = vmul.f32 0.015873017, %v466_v59 }
 0x1cc   : > { %1585 = vrsqrt.f32 %v2308_v60  ;;  %vm560_vm15 = vcmp.eq.f32.partialorder %v2308_v60, inf  ;;  %v563_v23 = vand.u32 2147483648, %v2308_v60  ;;  %vm539_vm0 = vcmp.eq.f32.partialorder %v2310_v61, inf }
 0x1cd   : > { %1587 = vrsqrt.f32 %v2310_v61  ;;  %v478_v35 = vpop.xlane.xlu1 %477  ;;  %v484_v63 = vpop.xlane.xlu0 %483  ;;  %vm562_vm1 = vcmp.eq.f32.partialorder %v2308_v60, 0.0  ;;  %v542_v34 = vand.u32 2147483648, %v2310_v61 }
 0x1ce   : > { %v1580_v0 = vpop.eup %1579  ;;  %v2314_v1 = vmul.f32 0.015873017, %v478_v35  ;;  %v2316_v20 = vmul.f32 0.015873017, %v484_v63 }
 0x1cf   : > { %v524_v21 = vmul.f32 %v1580_v0, %v507_v53 }
 0x1d0   : > { %1589 = vrsqrt.f32 %v2314_v1  ;;  %vm567_vm8 = vcmp.eq.f32.partialorder %v2314_v1, inf  ;;  %v570_v36 = vand.u32 2147483648, %v2314_v1  ;;  %vm581_vm7 = vcmp.eq.f32.partialorder %v2316_v20, inf }
 0x1d1   : > { %1591 = vrsqrt.f32 %v2316_v20  ;;  %v487_v2 = vpop.xlane.xlu1 %486  ;;  %v469_v3 = vpop.xlane.xlu0 %468  ;;  %v526_v14 = vsel %vm525_vm9, %v507_v53, %v524_v21  ;;  %vm541_vm9 = vcmp.eq.f32.partialorder %v2310_v61, 0.0  ;;  %v584_v39 = vand.u32 2147483648, %v2316_v20 }
 0x1d2   : > { %v2320_v4 = vmul.f32 0.015873017, %v487_v2  ;;  %v2322_v5 = vmul.f32 0.015873017, %v469_v3  ;;  %v1582_v6 = vpop.eup %1581  ;;  %v2344_v32 = vsel %vm527_vm10, %v528_v7, %v526_v14  ;;  %vm569_vm10 = vcmp.eq.f32.partialorder %v2314_v1, 0.0 }
 0x1d3   : > { %v1584_v11 = vpop.eup %1583  ;;  %v531_v25 = vmul.f32 %v1582_v6, %v2302_v56  ;;  %v667_v28 = vrot.slane %v2344_v32, %v2229_v15  ;;  %vm583_vm6 = vcmp.eq.f32.partialorder %v2316_v20, 0.0 }
 0x1d4   : > { %1593 = vrsqrt.f32 %v2320_v4  ;;  %v552_v31 = vmul.f32 %v1584_v11, %v2304_v57  ;;  %vm588_vm5 = vcmp.eq.f32.partialorder %v2320_v4, inf  ;;  %v591_v46 = vand.u32 2147483648, %v2320_v4 }
 0x1d5   : > { %1595 = vrsqrt.f32 %v2322_v5  ;;  %v481_v18 = vpop.xlane.xlu1 %480  ;;  %v490_v19 = vpop.xlane.xlu0 %489  ;;  %v533_v29 = vsel %vm532_vm11, %v2302_v56, %v531_v25  ;;  %vm546_vm4 = vcmp.eq.f32.partialorder %v2322_v5, inf  ;;  %v549_v16 = vand.u32 2147483648, %v2322_v5 }
 0x1d6   : > { %v1586_v22 = vpop.eup %1585  ;;  %v2335_v27 = vmul.f32 0.015873017, %v481_v18  ;;  %v2337_v24 = vmul.f32 0.015873017, %v490_v19  ;;  %v554_v45 = vsel %vm553_vm12, %v2304_v57, %v552_v31  ;;  %vm590_vm11 = vcmp.eq.f32.partialorder %v2320_v4, 0.0 }
 0x1d7   : > { %v1588_v30 = vpop.eup %1587  ;;  %v559_v33 = vmul.f32 %v1586_v22, %v2308_v60  ;;  %v2390_v54 = vsel %vm534_vm13, %v535_v8, %v533_v29  ;;  %v2394_v55 = vsel %vm555_vm14, %v556_v9, %v554_v45 }
 0x1d8   : > { %1597 = vrsqrt.f32 %v2335_v27  ;;  %v538_v12 = vmul.f32 %v1588_v30, %v2310_v61  ;;  %vm574_vm12 = vcmp.eq.f32.partialorder %v2335_v27, inf  ;;  %v577_v35 = vand.u32 2147483648, %v2335_v27 }
 0x1d9   : > { %1599 = vrsqrt.f32 %v2337_v24  ;;  %v496_v13 = vpop.xlane.xlu1 %495  ;;  %v499_v37 = vpop.xlane.xlu0 %498  ;;  %v561_v47 = vsel %vm560_vm15, %v2308_v60, %v559_v33  ;;  %vm595_vm15 = vcmp.eq.f32.partialorder %v2337_v24, inf  ;;  %v598_v63 = vand.u32 2147483648, %v2337_v24 }
 0x1da   : > { %v1590_v38 = vpop.eup %1589  ;;  %v2355_v40 = vmul.f32 0.015873017, %v496_v13  ;;  %v2357_v41 = vmul.f32 0.015873017, %v499_v37  ;;  %v540_v48 = vsel %vm539_vm0, %v2310_v61, %v538_v12  ;;  %vm548_vm0 = vcmp.eq.f32.partialorder %v2322_v5, 0.0 }
 0x1db   : > { %v1592_v44 = vpop.eup %1591  ;;  %v566_v17 = vmul.f32 %v1590_v38, %v2314_v1  ;;  %v2405_v56 = vsel %vm541_vm9, %v542_v34, %v540_v48  ;;  %v564_v57 = vsel %vm562_vm1, %v563_v23, %v561_v47  ;;  %vm576_vm13 = vcmp.eq.f32.partialorder %v2335_v27, 0.0 }
 0x1dc   : > { %1601 = vrsqrt.f32 %v2355_v40  ;;  %v580_v43 = vmul.f32 %v1592_v44, %v2316_v20  ;;  %vm609_vm14 = vcmp.eq.f32.partialorder %v2355_v40, inf  ;;  %v612_v60 = vand.u32 2147483648, %v2355_v40 }
 0x1dd   : > { %1603 = vrsqrt.f32 %v2357_v41  ;;  %v493_v49 = vpop.xlane.xlu1 %492  ;;  %v568_v0 = vsel %vm567_vm8, %v2314_v1, %v566_v17  ;;  %vm597_vm8 = vcmp.eq.f32.partialorder %v2337_v24, 0.0  ;;  %v619_v8 = vand.u32 2147483648, %v2357_v41 }
 0x1de   : > { %v502_v50 = vpop.xlane.xlu0 %501  ;;  %v1594_v51 = vpop.eup %1593  ;;  %v2384_v52 = vmul.f32 0.015873017, %v493_v49  ;;  %v582_v21 = vsel %vm581_vm7, %v2316_v20, %v580_v43  ;;  %vm616_vm7 = vcmp.eq.f32.partialorder %v2357_v41, inf  ;;  %v571_v18 = vsel %vm569_vm10, %v570_v36, %v568_v0 }
 0x1df   : > { %v2386_v53 = vmul.f32 0.015873017, %v502_v50  ;;  %v1596_v58 = vpop.eup %1595  ;;  %v587_v59 = vmul.f32 %v1594_v51, %v2320_v4  ;;  %v585_v19 = vsel %vm583_vm6, %v584_v39, %v582_v21  ;;  %vm611_vm1 = vcmp.eq.f32.partialorder %v2355_v40, 0.0 }
 0x1e0   : > { %1605 = vrsqrt.f32 %v2384_v52  ;;  %v545_v2 = vmul.f32 %v1596_v58, %v2322_v5  ;;  %vm618_vm9 = vcmp.eq.f32.partialorder %v2357_v41, 0.0  ;;  %vm604_vm3 = vcmp.eq.f32.partialorder %v2384_v52, 0.0 }
 0x1e1   : > { %1607 = vrsqrt.f32 %v2386_v53  ;;  %v505_v3 = vpop.xlane.xlu1 %504  ;;  %v589_v11 = vsel %vm588_vm5, %v2320_v4, %v587_v59  ;;  %vm602_vm5 = vcmp.eq.f32.partialorder %v2384_v52, inf  ;;  %v605_v1 = vand.u32 2147483648, %v2384_v52 }
 0x1e2   : > { %v1598_v61 = vpop.eup %1597  ;;  %v2420_v6 = vmul.f32 0.015873017, %v505_v3  ;;  %v547_v22 = vsel %vm546_vm4, %v2322_v5, %v545_v2  ;;  %v592_v30 = vsel %vm590_vm11, %v591_v46, %v589_v11  ;;  %vm623_vm6 = vcmp.eq.f32.partialorder %v2386_v53, inf }
 0x1e3   : > { %v1600_v7 = vpop.eup %1599  ;;  %v573_v14 = vmul.f32 %v1598_v61, %v2335_v27  ;;  %vm625_vm4 = vcmp.eq.f32.partialorder %v2386_v53, 0.0  ;;  %v550_v34 = vsel %vm548_vm0, %v549_v16, %v547_v22  ;;  %v626_v12 = vand.u32 2147483648, %v2386_v53 }
 0x1e4   : > { %v594_v9 = vmul.f32 %v1600_v7, %v2337_v24  ;;  %1609 = vrsqrt.f32 %v2420_v6  ;;  %v672_v36 = vrot.slane %v2390_v54, %v2222_v10  ;;  %vm630_vm10 = vcmp.eq.f32.partialorder %v2420_v6, inf }
 0x1e5   : > { %v575_v31 = vsel %vm574_vm12, %v2335_v27, %v573_v14  ;;  %vm632_vm11 = vcmp.eq.f32.partialorder %v2420_v6, 0.0  ;;  %v696_v37 = vrot.slane %v564_v57, %v2222_v10  ;;  %v679_v29 = vrot.slane %v2405_v56, %v2239_v26 }
 0x1e6   : > { %v1602_v23 = vpop.eup %1601  ;;  %v596_v33 = vsel %vm595_vm15, %v2337_v24, %v594_v9  ;;  %v578_v5 = vsel %vm576_vm13, %v577_v35, %v575_v31  ;;  %v686_v16 = vrot.slane %v550_v34, %v2251_v42  ;;  %v692_v27 = vrot.slane %v2394_v55, %v2229_v15  ;;  %v1438_v34 = vld [vmem:[%s2698_s3] ss:$0 sm:$0xff] }
 0x1e7   : > { %v1604_v20 = vpop.eup %1603  ;;  %v608_v25 = vmul.f32 %v1602_v23, %v2355_v40  ;;  %v599_v39 = vsel %vm597_vm8, %v598_v63, %v596_v33  ;;  %v701_v17 = vrot.slane %v571_v18, %v2239_v26  ;;  %v715_v43 = vrot.slane %v592_v30, %v2222_v10  ;;  %v1440_v18 = vld [vmem:[%s2700_s5] ss:$0 sm:$0xff] }
 0x1e8   : > { %v615_v4 = vmul.f32 %v1604_v20, %v2357_v41  ;;  %v706_v50 = vrot.slane %v578_v5, %v2251_v42  ;;  %v720_v51 = vrot.slane %v599_v39, %v2239_v26  ;;  %v711_v58 = vrot.slane %v585_v19, %v2229_v15 }
 0x1e9   : > { %v610_v13 = vsel %vm609_vm14, %v2355_v40, %v608_v25  ;;  %v697_v40 = vsel %vm673_vm2, %v696_v37, %v692_v27  ;;  %vm2736_vm12 = vcmask 261312   ;;  %v1043_v19 = vsub.s32 0, %v2213_v62 }
 0x1ea   : > { %v1606_v38 = vpop.eup %1605  ;;  %v617_v44 = vsel %vm616_vm7, %v2357_v41, %v615_v4  ;;  %v613_v47 = vsel %vm611_vm1, %v612_v60, %v610_v13  ;;  %v716_v21 = vsel %vm673_vm2, %v715_v43, %v711_v58  ;;  %vm2739_vm13 = vmmov %vm2736_vm12  ;;  %vm2742_vm7 = vcmask 1041409   ;;  %v1011_v58 = vld [vmem:[%s2098_s18 + $0x10] sm:$0xff] }
 0x1eb   : > { %v1608_v45 = vpop.eup %1607  ;;  %v601_v46 = vmul.f32 %v1606_v38, %v2384_v52  ;;  %v620_v48 = vsel %vm618_vm9, %v619_v8, %v617_v44  ;;  %v730_v59 = vrot.slane %v613_v47, %v2229_v15  ;;  %vm2740_vm14 = vmmov %vm2736_vm12  ;;  %vm2744_vm1 = vcmask 1042434  }
 0x1ec   : > { %v622_v24 = vmul.f32 %v1608_v45, %v2386_v53  ;;  %v734_v57 = vrot.slane %v620_v48, %v2222_v10  ;;  %vm2745_vm9 = vcmask 1043459   ;;  %v1081_v25 = vsub.s32 2, %v2213_v62 }
 0x1ed   : > { %v603_v49 = vsel %vm602_vm5, %v2384_v52, %v601_v46  ;;  %v633_v52 = vand.u32 2147483648, %v2420_v6  ;;  %vm2743_vm5 = vmmov %vm2736_vm12  ;;  %v1100_v33 = vsub.s32 3, %v2213_v62 }
 0x1ee   : > { %v1610_v54 = vpop.eup %1609  ;;  %v606_v55 = vsel %vm604_vm3, %v605_v1, %v603_v49  ;;  %v624_v41 = vsel %vm623_vm6, %v2386_v53, %v622_v24  ;;  %vm2735_vm3 = vcmask 195712   ;;  %v674_v53 = vsel %vm673_vm2, %v672_v36, %v667_v28 }
 0x1ef   : > { %v627_v35 = vsel %vm625_vm4, %v626_v12, %v624_v41  ;;  %v629_v63 = vmul.f32 %v1610_v54, %v2420_v6  ;;  %v725_v56 = vrot.slane %v606_v55, %v2251_v42  ;;  %v702_v0 = vsel %vm2735_vm3, %v701_v17, %v697_v40  ;;  %vm2737_vm15 = vmmov %vm2735_vm3 }
 0x1f0   : > { %v739_v2 = vrot.slane %v627_v35, %v2239_v26  ;;  %v707_v61 = vsel %vm2736_vm12, %v706_v50, %v702_v0  ;;  %v721_v10 = vsel %vm2737_vm15, %v720_v51, %v716_v21  ;;  %vm2738_vm0 = vmmov %vm2735_vm3  ;;  %v735_v14 = vsel %vm673_vm2, %v734_v57, %v730_v59  ;;  %v1012_v59 = vld [vmem:[%s2098_s18 + $0x18] sm:$0xff]  ;;  %v1009_v35 = vld [vmem:[%s2098_s18] sm:$0xff] }
 0x1f1   : > { %v631_v3 = vsel %vm630_vm10, %v2420_v6, %v629_v63  ;;  %v681_v7 = vsel %vm2738_vm0, %v679_v29, %v674_v53  ;;  %v726_v26 = vsel %vm2739_vm13, %v725_v56, %v721_v10  ;;  %vm2741_vm8 = vmmov %vm2738_vm0  ;;  %vm2746_vm6 = vcmask 261120   ;;  %v1010_v63 = vld [vmem:[%s2098_s18 + $0x8] sm:$0xff] }
 0x1f2   : > { %v634_v60 = vsel %vm632_vm11, %v633_v52, %v631_v3  ;;  %v688_v11 = vsel %vm2740_vm14, %v686_v16, %v681_v7  ;;  %v740_v15 = vsel %vm2741_vm8, %v739_v2, %v735_v14  ;;  %v1062_v1 = vsub.s32 1, %v2213_v62  ;;  %v1013_v3 = vld [vmem:[%s2098_s18 + $0x20] sm:$0xff]  ;;  %v1014_v53 = vld [vmem:[%s2098_s18 + $0x28] sm:$0xff] }
 0x1f3   : > { %v744_v8 = vrot.slane %v634_v60, %v2251_v42  ;;  %v747_v32 = vsel %vm2742_vm7, %v707_v61, %v688_v11  ;;  %v1017_v61 = vld [vmem:[%s2098_s18 + $0x40] sm:$0xff]  ;;  %v1018_v10 = vld [vmem:[%s2098_s18 + $0x48] sm:$0xff] }
 0x1f4   : > { %v749_v9 = vsel %vm2744_vm1, %v726_v26, %v747_v32 }
 0x1f5   : > { %v745_v28 = vsel %vm2743_vm5, %v744_v8, %v740_v15 }
 0x1f6   : > { %v751_v6 = vsel %vm2745_vm9, %v745_v28, %v749_v9 }
 0x1f7   : > { %1473 = vmatmul.mubr.msk.f32.vlgmr.msra.gmra.mrb[0].mxu0 %vm2746_vm6, %v751_v6  ;;  %v1015_v6 = vld [vmem:[%s2098_s18 + $0x30] sm:$0xff] }
 0x223   : > { %v1005_v22 = vpop.f32.mrb[0].mxu1 }
 0x224   : > { %v1006_v42 = vadd.f32 %v1440_v18, %v1005_v22  ;;  %v1485_v23 = vpop.f32.mrb[1].mxu1  ;;  %v1016_v18 = vld [vmem:[%s2098_s18 + $0x38] sm:$0xff]  ;;  %v1022_v22 = vld [vmem:[%s2098_s18 + $0x68] sm:$0xff] }
 0x226   : > { %v1152_v30 = vrot.slane %v1006_v42, %v1043_v19  ;;  %v1171_v20 = vrot.slane %v1006_v42, %v1062_v1  ;;  %v1190_v31 = vrot.slane %v1006_v42, %v1081_v25  ;;  %v1209_v4 = vrot.slane %v1006_v42, %v1100_v33 }
 0x228   : > { %1158 = vbcast.lane.b32.xlu1 %v1152_v30, 264  ;;  %1154 = vbcast.lane.b32.xlu0 %v1152_v30, 256 }
 0x22c   : > { %1166 = vbcast.lane.b32.xlu1 %v1152_v30, 280  ;;  %1162 = vbcast.lane.b32.xlu0 %v1152_v30, 272 }
 0x230   : > { %1177 = vbcast.lane.b32.xlu1 %v1171_v20, 264  ;;  %1173 = vbcast.lane.b32.xlu0 %v1171_v20, 256 }
 0x234   : > { %1185 = vbcast.lane.b32.xlu1 %v1171_v20, 280  ;;  %1181 = vbcast.lane.b32.xlu0 %v1171_v20, 272 }
 0x238   : > { %1196 = vbcast.lane.b32.xlu1 %v1190_v31, 264  ;;  %1192 = vbcast.lane.b32.xlu0 %v1190_v31, 256 }
 0x23c   : > { %1204 = vbcast.lane.b32.xlu1 %v1190_v31, 280  ;;  %1200 = vbcast.lane.b32.xlu0 %v1190_v31, 272 }
 0x240   : > { %1215 = vbcast.lane.b32.xlu1 %v1209_v4, 264  ;;  %1211 = vbcast.lane.b32.xlu0 %v1209_v4, 256 }
 0x29a   : > { %v1159_v47 = vpop.permute.xlu1 %1158  ;;  %v1155_v16 = vpop.permute.xlu0 %1154 }
 0x29e   : > { %v2540_v27 = vpop.permute.xlu1 %1166  ;;  %v1163_v24 = vpop.permute.xlu0 %1162 }
 0x2a2   : > { %v2542_v48 = vpop.permute.xlu1 %1177  ;;  %v1174_v17 = vpop.permute.xlu0 %1173 }
 0x2a6   : > { %v2544_v43 = vpop.permute.xlu1 %1185  ;;  %v1182_v49 = vpop.permute.xlu0 %1181 }
 0x2aa   : > { %v2546_v40 = vpop.permute.xlu1 %1196  ;;  %v2548_v50 = vpop.permute.xlu0 %1192 }
 0x2ae   : > { %v2550_v51 = vpop.permute.xlu1 %1204  ;;  %v2552_v54 = vpop.permute.xlu0 %1200 }
 0x2b2   : > { %v2554_v55 = vpop.permute.xlu1 %1215  ;;  %v2556_v41 = vpop.permute.xlu0 %1211 }
 0x2ca   : > { %v821_v12 = vpop.f32.mrb[0].mxu0 }
 0x2cb   : > { %v822_v36 = vadd.f32 %v1438_v34, %v821_v12  ;;  %v1474_v13 = vpop.f32.mrb[1].mxu0  ;;  %v1019_v12 = vld [vmem:[%s2098_s18 + $0x50] sm:$0xff] }
 0x2cc   : > { %v1025_v13 = vld [vmem:[%s2098_s18 + $0x80] sm:$0xff] }
 0x2cd   : > { %v825_v37 = vsub.f32 0.0, %v822_v36  ;;  %v1020_v36 = vld [vmem:[%s2098_s18 + $0x58] sm:$0xff] }
 0x2cf   : > { %v826_v38 = vmul.f32 1.442695, %v825_v37  ;;  %v1026_v37 = vld [vmem:[%s2098_s18 + $0x88] sm:$0xff] }
 0x2d1   : > { %1611 = vpow2.f32 %v826_v38 }
 0x2db   : > { %v1612_v5 = vpop.eup %1611 }
 0x2dc   : > { %v828_v39 = vadd.f32 1.0, %v1612_v5 }
 0x2de   : > { %1613 = vrcp.f32 %v828_v39 }
 0x2e8   : > { %v1614_v44 = vpop.eup %1613 }
 0x2e9   : > { %v1044_v62 = vrot.slane %v1614_v44, %v1043_v19  ;;  %v1063_v29 = vrot.slane %v1614_v44, %v1062_v1  ;;  %v1082_v45 = vrot.slane %v1614_v44, %v1081_v25  ;;  %v1101_v46 = vrot.slane %v1614_v44, %v1100_v33  ;;  %v1021_v19 = vld [vmem:[%s2098_s18 + $0x60] sm:$0xff] }
 0x2eb   : > { %1050 = vbcast.lane.b32.xlu1 %v1044_v62, 264  ;;  %1046 = vbcast.lane.b32.xlu0 %v1044_v62, 256 }
 0x2ef   : > { %1054 = vbcast.lane.b32.xlu1 %v1044_v62, 272  ;;  %1065 = vbcast.lane.b32.xlu0 %v1063_v29, 256 }
 0x2f3   : > { %1058 = vbcast.lane.b32.xlu1 %v1044_v62, 280  ;;  %1073 = vbcast.lane.b32.xlu0 %v1063_v29, 272 }
 0x2f7   : > { %1069 = vbcast.lane.b32.xlu1 %v1063_v29, 264  ;;  %1084 = vbcast.lane.b32.xlu0 %v1082_v45, 256 }
 0x2fb   : > { %1077 = vbcast.lane.b32.xlu1 %v1063_v29, 280  ;;  %1092 = vbcast.lane.b32.xlu0 %v1082_v45, 272 }
 0x2ff   : > { %1088 = vbcast.lane.b32.xlu1 %v1082_v45, 264  ;;  %1103 = vbcast.lane.b32.xlu0 %v1101_v46, 256 }
 0x303   : > { %1096 = vbcast.lane.b32.xlu1 %v1082_v45, 280  ;;  %1111 = vbcast.lane.b32.xlu0 %v1101_v46, 272 }
 0x307   : > { %1107 = vbcast.lane.b32.xlu1 %v1101_v46, 264  ;;  %1219 = vbcast.lane.b32.xlu0 %v1209_v4, 272 }
 0x30b   : > { %1115 = vbcast.lane.b32.xlu1 %v1101_v46, 280 }
 0x30f   : > { %1223 = vbcast.lane.b32.xlu1 %v1209_v4, 280 }
 0x35d   : > { %v1051_v56 = vpop.permute.xlu1 %1050  ;;  %v1047_v57 = vpop.permute.xlu0 %1046 }
 0x35e   : > { %v1119_v52 = vmul.f32 %v1051_v56, %v1011_v58  ;;  %v1120_v0 = vmul.f32 %v1051_v56, %v1012_v59  ;;  %v1117_v21 = vmul.f32 %v1047_v57, %v1009_v35  ;;  %v1118_v2 = vmul.f32 %v1047_v57, %v1010_v63  ;;  %v1030_v58 = vld [vmem:[%s2098_s18 + $0xa8] sm:$0xff] }
 0x360   : > { %v1227_v60 = vadd.f32 %v1159_v47, %v1119_v52  ;;  %v1228_v7 = vadd.f32 %v1159_v47, %v1120_v0  ;;  %v1225_v26 = vadd.f32 %v1155_v16, %v1117_v21  ;;  %v1226_v11 = vadd.f32 %v1155_v16, %v1118_v2 }
 0x361   : > { %v1055_v14 = vpop.permute.xlu1 %1054  ;;  %v1066_v8 = vpop.permute.xlu0 %1065 }
 0x362   : > { %1259 = vst [vmem:[%s2568_s14 + $0x10] sm:$0xff] %v1227_v60  ;;  %1260 = vst [vmem:[%s2568_s14 + $0x18] sm:$0xff] %v1228_v7  ;;  %v1121_v15 = vmul.f32 %v1055_v14, %v1013_v3  ;;  %v1122_v32 = vmul.f32 %v1055_v14, %v1014_v53  ;;  %v1125_v28 = vmul.f32 %v1066_v8, %v1017_v61  ;;  %v1028_v3 = vld [vmem:[%s2098_s18 + $0x98] sm:$0xff]  ;;  %v1033_v53 = vld [vmem:[%s2098_s18 + $0xc0] sm:$0xff] }
 0x363   : > { %1257 = vst [vmem:[%s2568_s14] sm:$0xff] %v1225_v26  ;;  %1258 = vst [vmem:[%s2568_s14 + $0x8] sm:$0xff] %v1226_v11  ;;  %v1126_v9 = vmul.f32 %v1066_v8, %v1018_v10  ;;  %v1034_v61 = vld [vmem:[%s2098_s18 + $0xc8] sm:$0xff] }
 0x364   : > { %v1229_v42 = vadd.f32 %v1163_v24, %v1121_v15  ;;  %v1230_v23 = vadd.f32 %v1163_v24, %v1122_v32  ;;  %v1233_v30 = vadd.f32 %v1174_v17, %v1125_v28  ;;  %v1023_v24 = vld [vmem:[%s2098_s18 + $0x70] sm:$0xff]  ;;  %v1032_v28 = vld [vmem:[%s2098_s18 + $0xb8] sm:$0xff] }
 0x365   : > { %v1234_v1 = vadd.f32 %v1174_v17, %v1126_v9  ;;  %v1059_v20 = vpop.permute.xlu1 %1058  ;;  %v1074_v25 = vpop.permute.xlu0 %1073  ;;  %v1024_v17 = vld [vmem:[%s2098_s18 + $0x78] sm:$0xff]  ;;  %v1031_v32 = vld [vmem:[%s2098_s18 + $0xb0] sm:$0xff] }
 0x366   : > { %1261 = vst [vmem:[%s2568_s14 + $0x20] sm:$0xff] %v1229_v42  ;;  %1262 = vst [vmem:[%s2568_s14 + $0x28] sm:$0xff] %v1230_v23  ;;  %v1123_v31 = vmul.f32 %v1059_v20, %v1015_v6  ;;  %v1124_v33 = vmul.f32 %v1059_v20, %v1016_v18  ;;  %v1129_v4 = vmul.f32 %v1074_v25, %v1021_v19  ;;  %v1038_v42 = vld [vmem:[%s2098_s18 + $0xe8] sm:$0xff]  ;;  %v1035_v20 = vld [vmem:[%s2098_s18 + $0xd0] sm:$0xff] }
 0x367   : > { %1265 = vst [vmem:[%s2568_s14 + $0x40] sm:$0xff] %v1233_v30  ;;  %1266 = vst [vmem:[%s2568_s14 + $0x48] sm:$0xff] %v1234_v1  ;;  %v1130_v34 = vmul.f32 %v1074_v25, %v1022_v22  ;;  %v1037_v22 = vld [vmem:[%s2098_s18 + $0xe0] sm:$0xff]  ;;  %v1036_v25 = vld [vmem:[%s2098_s18 + $0xd8] sm:$0xff] }
 0x368   : > { %v1231_v38 = vadd.f32 %v2540_v27, %v1123_v31  ;;  %v1232_v5 = vadd.f32 %v2540_v27, %v1124_v33  ;;  %v1237_v39 = vadd.f32 %v1182_v49, %v1129_v4  ;;  %v1029_v27 = vld [vmem:[%s2098_s18 + $0xa0] sm:$0xff] }
 0x369   : > { %v1238_v44 = vadd.f32 %v1182_v49, %v1130_v34  ;;  %v1070_v62 = vpop.permute.xlu1 %1069  ;;  %v1085_v29 = vpop.permute.xlu0 %1084 }
 0x36a   : > { %1263 = vst [vmem:[%s2568_s14 + $0x30] sm:$0xff] %v1231_v38  ;;  %1264 = vst [vmem:[%s2568_s14 + $0x38] sm:$0xff] %v1232_v5  ;;  %v1127_v45 = vmul.f32 %v1070_v62, %v1019_v12  ;;  %v1128_v46 = vmul.f32 %v1070_v62, %v1020_v36  ;;  %v1133_v47 = vmul.f32 %v1085_v29, %v1025_v13 }
 0x36b   : > { %1269 = vst [vmem:[%s2568_s14 + $0x60] sm:$0xff] %v1237_v39  ;;  %1270 = vst [vmem:[%s2568_s14 + $0x68] sm:$0xff] %v1238_v44  ;;  %v1134_v16 = vmul.f32 %v1085_v29, %v1026_v37  ;;  %v1040_v39 = vld [vmem:[%s2098_s18 + $0xf8] sm:$0xff] }
 0x36c   : > { %v1235_v49 = vadd.f32 %v2542_v48, %v1127_v45  ;;  %v1236_v59 = vadd.f32 %v2542_v48, %v1128_v46  ;;  %v1241_v35 = vadd.f32 %v2548_v50, %v1133_v47  ;;  %v1027_v48 = vld [vmem:[%s2098_s18 + $0x90] sm:$0xff] }
 0x36d   : > { %v1242_v63 = vadd.f32 %v2548_v50, %v1134_v16  ;;  %v1078_v56 = vpop.permute.xlu1 %1077  ;;  %v1093_v57 = vpop.permute.xlu0 %1092 }
 0x36e   : > { %1267 = vst [vmem:[%s2568_s14 + $0x50] sm:$0xff] %v1235_v49  ;;  %1268 = vst [vmem:[%s2568_s14 + $0x58] sm:$0xff] %v1236_v59  ;;  %v1131_v52 = vmul.f32 %v1078_v56, %v1023_v24  ;;  %v1132_v0 = vmul.f32 %v1078_v56, %v1024_v17  ;;  %v1137_v21 = vmul.f32 %v1093_v57, %v1029_v27 }
 0x36f   : > { %1273 = vst [vmem:[%s2568_s14 + $0x80] sm:$0xff] %v1241_v35  ;;  %1274 = vst [vmem:[%s2568_s14 + $0x88] sm:$0xff] %v1242_v63  ;;  %v1138_v2 = vmul.f32 %v1093_v57, %v1030_v58 }
 0x370   : > { %v1239_v50 = vadd.f32 %v2544_v43, %v1131_v52  ;;  %v1240_v10 = vadd.f32 %v2544_v43, %v1132_v0  ;;  %v1245_v60 = vadd.f32 %v2552_v54, %v1137_v21 }
 0x371   : > { %v1246_v7 = vadd.f32 %v2552_v54, %v1138_v2  ;;  %v1089_v26 = vpop.permute.xlu1 %1088  ;;  %v1104_v11 = vpop.permute.xlu0 %1103 }
 0x372   : > { %1271 = vst [vmem:[%s2568_s14 + $0x70] sm:$0xff] %v1239_v50  ;;  %1272 = vst [vmem:[%s2568_s14 + $0x78] sm:$0xff] %v1240_v10  ;;  %v1135_v14 = vmul.f32 %v1089_v26, %v1027_v48  ;;  %v1136_v8 = vmul.f32 %v1089_v26, %v1028_v3  ;;  %v1141_v15 = vmul.f32 %v1104_v11, %v1033_v53 }
 0x373   : > { %1277 = vst [vmem:[%s2568_s14 + $0xa0] sm:$0xff] %v1245_v60  ;;  %1278 = vst [vmem:[%s2568_s14 + $0xa8] sm:$0xff] %v1246_v7  ;;  %v1142_v43 = vmul.f32 %v1104_v11, %v1034_v61 }
 0x374   : > { %v1243_v54 = vadd.f32 %v2546_v40, %v1135_v14  ;;  %v1244_v9 = vadd.f32 %v2546_v40, %v1136_v8  ;;  %v1249_v6 = vadd.f32 %v2556_v41, %v1141_v15 }
 0x375   : > { %v1250_v18 = vadd.f32 %v2556_v41, %v1142_v43  ;;  %v1097_v19 = vpop.permute.xlu1 %1096  ;;  %v1112_v23 = vpop.permute.xlu0 %1111 }
 0x376   : > { %1275 = vst [vmem:[%s2568_s14 + $0x90] sm:$0xff] %v1243_v54  ;;  %1276 = vst [vmem:[%s2568_s14 + $0x98] sm:$0xff] %v1244_v9  ;;  %v1139_v30 = vmul.f32 %v1097_v19, %v1031_v32  ;;  %v1140_v1 = vmul.f32 %v1097_v19, %v1032_v28  ;;  %v1145_v31 = vmul.f32 %v1112_v23, %v1037_v22 }
 0x377   : > { %1281 = vst [vmem:[%s2568_s14 + $0xc0] sm:$0xff] %v1249_v6  ;;  %1282 = vst [vmem:[%s2568_s14 + $0xc8] sm:$0xff] %v1250_v18  ;;  %v1146_v33 = vmul.f32 %v1112_v23, %v1038_v42 }
 0x378   : > { %v1247_v40 = vadd.f32 %v2550_v51, %v1139_v30  ;;  %v1248_v41 = vadd.f32 %v2550_v51, %v1140_v1  ;;  %v1039_v51 = vld [vmem:[%s2098_s18 + $0xf0] sm:$0xff] }
 0x379   : > { %v1108_v4 = vpop.permute.xlu1 %1107  ;;  %v1220_v34 = vpop.permute.xlu0 %1219 }
 0x37a   : > { %1279 = vst [vmem:[%s2568_s14 + $0xb0] sm:$0xff] %v1247_v40  ;;  %1280 = vst [vmem:[%s2568_s14 + $0xb8] sm:$0xff] %v1248_v41  ;;  %v1143_v12 = vmul.f32 %v1108_v4, %v1035_v20  ;;  %v1144_v36 = vmul.f32 %v1108_v4, %v1036_v25  ;;  %v1253_v13 = vadd.f32 %v1220_v34, %v1145_v31 }
 0x37b   : > { %v1254_v37 = vadd.f32 %v1220_v34, %v1146_v33 }
 0x37c   : > { %v1251_v38 = vadd.f32 %v2554_v55, %v1143_v12  ;;  %v1252_v5 = vadd.f32 %v2554_v55, %v1144_v36  ;;  %1285 = vst [vmem:[%s2568_s14 + $0xe0] sm:$0xff] %v1253_v13 }
 0x37d   : > { %1286 = vst [vmem:[%s2568_s14 + $0xe8] sm:$0xff] %v1254_v37  ;;  %v1116_v44 = vpop.permute.xlu1 %1115 }
 0x37e   : > { %1283 = vst [vmem:[%s2568_s14 + $0xd0] sm:$0xff] %v1251_v38  ;;  %1284 = vst [vmem:[%s2568_s14 + $0xd8] sm:$0xff] %v1252_v5  ;;  %v1147_v62 = vmul.f32 %v1116_v44, %v1039_v51  ;;  %v1148_v29 = vmul.f32 %v1116_v44, %v1040_v39 }
 0x381   : > { %v1224_v45 = vpop.permute.xlu1 %1223 }
 0x382   : > { %v1255_v55 = vadd.f32 %v1224_v45, %v1147_v62  ;;  %v1256_v46 = vadd.f32 %v1224_v45, %v1148_v29 }
 0x384   : > { %1287 = vst [vmem:[%s2568_s14 + $0xf0] sm:$0xff] %v1255_v55  ;;  %1288 = vst [vmem:[%s2568_s14 + $0xf8] sm:$0xff] %v1256_v46 }
 0x385   : > { %1744 = shalt.err (!%p1741_p7)
}
 0x386   : > { %s1745_s0 = scalar_lea.hbm %s2647_s11, 4096  ;;  %s1749_s18 = scalar_lea.hbm %s2701_s6, 8192 }
 0x387   : > { %p1746_p9 = scmp.ne.s32.totalorder %s2647_s11, %s1745_s0  ;;  %p1750_p11 = scmp.lt.u32.totalorder %s2647_s11, %s2701_s6 }
 0x388   : > { %p1751_p2 = scmp.lt.u32.totalorder %s1749_s18, %s1745_s0  ;;  %p1753_p1 = scmp.lt.u32.totalorder %s1745_s0, %s2647_s11 }
 0x389   : > { %p1747_p0 = pnand %p1746_p9, %p2747_p13 }
 0x38a   : > { %p1752_p12 = por %p1751_p2, %p1750_p11 }
 0x38b   : > { %p1748_p8 = pneg %p1747_p0 }
 0x38c   : > { %p1754_p6 = por %p1753_p1, %p1752_p12 }
 0x38e   : > { %p1755_p10 = pnand %p1754_p6, %p1748_p8 }
 0x390   : > { %1758 = shalt.err (!%p1755_p10)
}
 0x391   : > { %s1823_s12 = smov 256   ;;  %s1824_s17 = smov 16  }
 0x392   : > { %1510 = dma.vmem_to_hbm [thread:$0]  (%p2747_p13), %s2649_s30, 4096, %s2647_s11, %s1290_s10, %s1823_s12, %s1823_s12, %s1824_s17  }
 0x393 PF: > { %s1319_s14 = sand.u32 1, %s1797_s21   ;;  %p2748_p4 = scmp.ne.s32.totalorder %s2717_s28, 0 }
 0x394   : > { %p2749_p5 = scmp.ge.s32.totalorder %s1809_s24, 2  ;;  %s1320_s2 = scalar_lea.sflag [#allocation4], %s1319_s14 }
 0x396   : > { %p1527_p3 = pnand %p2749_p5, %p2748_p4 }
 0x398   : > { %1792 = dma.done.wait (!%p1527_p3), %s1320_s2, 4096  }
 0x399   : > { %1794 = vsyncadd (!%p1527_p3), %s1320_s2, 4294963200  ;;  %s2750_s15 = sld [smem:[#allocation16_spill]]  ;;  %p23_p7 = scmp.ge.s32.totalorder %s1976_s8, 4  }
 0x39a   : > { %s2751_s21 = smov %s1801_s22  ;;  %s2752_s22 = smov %s1805_s23 }
 0x39b   : > { %s2754_s24 = smov %s1976_s8  ;;  %25 = sbr.rel (!%p23_p7) target bundleno = 12 (0xc), region = 110 }
 0x39f   : > { %s2753_s23 = smov %s2750_s15 }
 0x3a2   :  { %1325 = vsyncpa [#allocation3], 1 }
 0x3a3   :  { %1327 = vsyncpa [#allocation3 + $0x1], 1 }
 0x3a4   :  { %1328 = vsyncpa [#allocation6], 1 }
 0x3a5   :  { %1330 = vsyncpa [#allocation6 + $0x1], 1 }
 0x3a6   :  { %1331 = vsyncpa [#allocation9], 1 }
 0x3a7   :  { %1332 = vsyncpa [#allocation4], 1 }
 0x3a8   :  { %1334 = vsyncpa [#allocation4 + $0x1], 1 }

</bundles_post_ra>
